<compile_context>
chip_gen: v5e
topology: v5e:2x2
jax: 0.10.0
libtpu: 0.0.40
codegen_flags: <defaults>
</compile_context>

<pallas_src>
import functools

import jax
import jax.numpy as jnp
from jax.experimental import pallas as pl
from jax.experimental.pallas import tpu as pltpu


# ------------------------------- Pallas kernel -------------------------------

def _linear_mlp_kernel(x_ref, w1_ref, w2_ref, o_ref):
    # x_ref : (C, TN)         activation tile, pixels on the lane axis
    # w1_ref: (hidden, C)     resident in VMEM
    # w2_ref: (c_out, hidden) resident in VMEM
    # o_ref : (c_out, TN)
    h = jnp.dot(w1_ref[...], x_ref[...], preferred_element_type=jnp.float32)
    h = h * jax.nn.sigmoid(h)                     # SiLU in f32 (EUP); v5e-safe
    y = jnp.dot(w2_ref[...], h.astype(w2_ref.dtype),
                preferred_element_type=jnp.float32)
    o_ref[...] = y.astype(o_ref.dtype)


# --------------------------------- wrapper -----------------------------------

def linear_mlp_forward(x, w1, w2, *, block_pixels=512,
                       compute_dtype=jnp.bfloat16,
                       vmem_limit_bytes=48 * 1024 * 1024):
    """LinearMLP forward.

    x  : (B, C, H, W)        NCHW, matching the PyTorch module.
    w1 : (hidden, C)         = torch w1.weight[:, :, 0, 0]   (bias=False per module)
    w2 : (c_out, hidden)     = torch w2.weight[:, :, 0, 0]   (bias=False per module)
    compute_dtype: matmul operand dtype (default bf16); accumulation stays f32.
    """
    B, C, H, W = x.shape
    hidden, c_in = w1.shape
    c_out, hidden2 = w2.shape
    assert c_in == C and hidden2 == hidden
    out_dtype = x.dtype

    n_pix = H * W
    x3 = x.reshape(B, C, n_pix)               # free: contiguous merge, no transpose

    if compute_dtype is not None:
        x3 = x3.astype(compute_dtype)
        w1 = w1.astype(compute_dtype)
        w2 = w2.astype(compute_dtype)

    # Pixel tile: full axis if it fits, else a multiple of 128 that (preferably)
    # divides n_pix so no padding copy is needed.
    if n_pix <= block_pixels:
        tn = n_pix
        padded_pix = n_pix
    else:
        tn = max(128, (min(block_pixels, n_pix) // 128) * 128)
        while tn > 128 and n_pix % tn != 0:
            tn -= 128
        padded_pix = pl.cdiv(n_pix, tn) * tn
        if padded_pix != n_pix:                # rare fallback: n_pix not 128-aligned
            x3 = jnp.pad(x3, ((0, 0), (0, 0), (0, padded_pix - n_pix)))

    grid = (B, padded_pix // tn)

    itemsize = jnp.dtype(x3.dtype).itemsize
    bytes_accessed = (B * C * padded_pix * itemsize
                      + (hidden * C + c_out * hidden) * itemsize
                      + B * c_out * padded_pix * jnp.dtype(out_dtype).itemsize)

    out3 = pl.pallas_call(
        _linear_mlp_kernel,
        out_shape=jax.ShapeDtypeStruct((B, c_out, padded_pix), out_dtype),
        grid_spec=pltpu.PrefetchScalarGridSpec(
            num_scalar_prefetch=0,
            grid=grid,
            in_specs=[
                pl.BlockSpec((None, C, tn), lambda b, j: (b, 0, j)),      # pipelined tile
                pl.BlockSpec((hidden, C), lambda b, j: (0, 0)),           # W1 resident
                pl.BlockSpec((c_out, hidden), lambda b, j: (0, 0)),       # W2 resident
            ],
            out_specs=pl.BlockSpec((None, c_out, tn), lambda b, j: (b, 0, j)),
        ),
        compiler_params=pltpu.CompilerParams(
            dimension_semantics=("parallel", "parallel"),  # megacore-shard on v7x
            vmem_limit_bytes=vmem_limit_bytes,
        ),
        cost_estimate=pl.CostEstimate(
            flops=2 * B * n_pix * (C * hidden + hidden * c_out),
            transcendentals=B * n_pix * hidden,            # sigmoid exp
            bytes_accessed=bytes_accessed,
        ),
    )(x3, w1, w2)

    if padded_pix != n_pix:
        out3 = out3[:, :, :n_pix]
    # TODO(synk): nn.Dropout with p > 0 (training mode) not implemented; p=0 / eval is identity.
    return out3.reshape(B, c_out, H, W)


# ----------------------------------- main ------------------------------------

if __name__ == "__main__":
    key = jax.random.PRNGKey(0)
    kx, k1, k2 = jax.random.split(key, 3)

    # Module defaults: dim=4, multiple_of=1 -> hidden = int(2*(4*4)/3) = 10, out_dim=4.
    B, C, H, W = 2, 4, 16, 16
    multiple_of = 1
    hidden = int(2 * (4 * C) / 3)
    hidden = multiple_of * ((hidden + multiple_of - 1) // multiple_of)
    c_out = C

    x = jax.random.normal(kx, (B, C, H, W), dtype=jnp.float32)
    # torch Conv2d(C, hidden, 1, bias=False).weight[:, :, 0, 0] -> (hidden, C)
    b1 = 1.0 / (C ** 0.5)
    w1 = jax.random.uniform(k1, (hidden, C), jnp.float32, -b1, b1)
    b2 = 1.0 / (hidden ** 0.5)
    w2 = jax.random.uniform(k2, (c_out, hidden), jnp.float32, -b2, b2)

    # Pure-JAX f32 reference.
    x3_ref = x.reshape(B, C, H * W)
    h_ref = jnp.einsum('hc,bcn->bhn', w1, x3_ref)
    h_ref = h_ref * jax.nn.sigmoid(h_ref)
    y_ref = jnp.einsum('oh,bhn->bon', w2, h_ref).reshape(B, c_out, H, W)

    # f32 operand path.
    fwd_f32 = jax.jit(functools.partial(linear_mlp_forward, compute_dtype=None))
    y_f32 = fwd_f32(x, w1, w2)
    jax.block_until_ready(y_f32)
    assert y_f32.shape == (B, c_out, H, W) and y_f32.dtype == jnp.float32
    assert bool(jnp.allclose(y_f32, y_ref, atol=1e-2, rtol=1e-2))

    # Default bf16 operand path (MXU / DMA fast path); accumulation is f32.
    fwd_bf16 = jax.jit(linear_mlp_forward)
    y_bf16 = fwd_bf16(x, w1, w2)
    jax.block_until_ready(y_bf16)
    assert y_bf16.shape == (B, c_out, H, W) and y_bf16.dtype == jnp.float32
    assert bool(jnp.allclose(y_bf16, y_ref, atol=5e-2, rtol=5e-2))

    print("KERNEL_OK")
</pallas_src>

<mosaic_0001>
module attributes {stable_mosaic.version = 11 : i64} {
  func.func @_linear_mlp_kernel(%arg0: i32, %arg1: i32, %arg2: memref<1x4x256xf32, #tpu.memory_space<vmem>>, %arg3: memref<10x4xf32, #tpu.memory_space<vmem>>, %arg4: memref<4x10xf32, #tpu.memory_space<vmem>>, %arg5: memref<1x4x256xf32, #tpu.memory_space<vmem>>) attributes {dimension_semantics = [#tpu.dimension_semantics<parallel>, #tpu.dimension_semantics<parallel>], iteration_bounds = array<i64: 2, 1>, scalar_prefetch = 0 : i64, scratch_operands = 0 : i64, tpu.core_type = #tpu.core_type<tc>, window_params = [{transform_indices = @transform_0, window_bounds = array<i64: 1, 4, 256>}, {pipeline_mode = #tpu.pipeline_mode<synchronous>, transform_indices = @transform_1, window_bounds = array<i64: 10, 4>}, {pipeline_mode = #tpu.pipeline_mode<synchronous>, transform_indices = @transform_2, window_bounds = array<i64: 4, 10>}, {transform_indices = @transform_3, window_bounds = array<i64: 1, 4, 256>}]} {
    %c0 = arith.constant 0 : index
    %c0_0 = arith.constant 0 : index
    %0 = vector.load %arg3[%c0, %c0_0] : memref<10x4xf32, #tpu.memory_space<vmem>>, vector<10x4xf32>
    %c0_1 = arith.constant 0 : index
    %c0_2 = arith.constant 0 : index
    %c0_3 = arith.constant 0 : index
    %1 = vector.load %arg2[%c0_1, %c0_2, %c0_3] : memref<1x4x256xf32, #tpu.memory_space<vmem>>, vector<1x4x256xf32>
    %2 = vector.shape_cast %1 : vector<1x4x256xf32> to vector<4x256xf32>
    %cst = arith.constant dense<0.000000e+00> : vector<10x256xf32>
    %3 = tpu.matmul %0, %2, %cst {dimension_numbers = #tpu.dot_dimension_numbers<[1], [0], [0], [1], [0, 0, 1, 1], [], []>} : vector<10x4xf32>, vector<4x256xf32>, vector<10x256xf32> -> vector<10x256xf32>
    %4 = arith.negf %3 : vector<10x256xf32>
    %5 = math.exp %4 : vector<10x256xf32>
    %cst_4 = arith.constant 1.000000e+00 : f32
    %6 = vector.broadcast %cst_4 : f32 to vector<10x256xf32>
    %7 = arith.addf %6, %5 : vector<10x256xf32>
    %8 = arith.divf %6, %7 : vector<10x256xf32>
    %9 = arith.mulf %3, %8 : vector<10x256xf32>
    %c0_5 = arith.constant 0 : index
    %c0_6 = arith.constant 0 : index
    %10 = vector.load %arg4[%c0_5, %c0_6] : memref<4x10xf32, #tpu.memory_space<vmem>>, vector<4x10xf32>
    %cst_7 = arith.constant dense<0.000000e+00> : vector<4x256xf32>
    %11 = tpu.matmul %10, %9, %cst_7 {dimension_numbers = #tpu.dot_dimension_numbers<[1], [0], [0], [1], [0, 0, 1, 1], [], []>} : vector<4x10xf32>, vector<10x256xf32>, vector<4x256xf32> -> vector<4x256xf32>
    %c0_8 = arith.constant 0 : index
    %c0_9 = arith.constant 0 : index
    %c0_10 = arith.constant 0 : index
    %12 = vector.load %arg5[%c0_8, %c0_9, %c0_10] : memref<1x4x256xf32, #tpu.memory_space<vmem>>, vector<1x4x256xf32>
    %13 = vector.shape_cast %12 : vector<1x4x256xf32> to vector<4x256xf32>
    %14 = vector.shape_cast %11 : vector<4x256xf32> to vector<1x4x256xf32>
    tpu.vector_store %arg5[%c0_8, %c0_9, %c0_10], %14 {strides = array<i32>} : memref<1x4x256xf32, #tpu.memory_space<vmem>>, vector<1x4x256xf32>,
    return
  }
  func.func @transform_0(%arg0: i32, %arg1: i32) -> (i32, i32, i32) {
    %c0_i32 = arith.constant 0 : i32
    %c0_i32_0 = arith.constant 0 : i32
    return %arg0, %c0_i32, %arg1 : i32, i32, i32
  }
  func.func @transform_1(%arg0: i32, %arg1: i32) -> (i32, i32) {
    %c0_i32 = arith.constant 0 : i32
    %c0_i32_0 = arith.constant 0 : i32
    %c0_i32_1 = arith.constant 0 : i32
    return %c0_i32, %c0_i32_0 : i32, i32
  }
  func.func @transform_2(%arg0: i32, %arg1: i32) -> (i32, i32) {
    %c0_i32 = arith.constant 0 : i32
    %c0_i32_0 = arith.constant 0 : i32
    %c0_i32_1 = arith.constant 0 : i32
    return %c0_i32, %c0_i32_0 : i32, i32
  }
  func.func @transform_3(%arg0: i32, %arg1: i32) -> (i32, i32, i32) {
    %c0_i32 = arith.constant 0 : i32
    %c0_i32_0 = arith.constant 0 : i32
    return %arg0, %c0_i32, %arg1 : i32, i32, i32
  }
}

</mosaic_0001>

<bundles_post_ra>
// kernel: linear_mlp_forward.1
= control target key start
LH: loop header
LB: loop body
LE: loop exit
PB: predicated region body
PF: predicated region fallthrough
CT: control target
= control target key end

     0   :  { %s611_s12 = smov 0   ;;  %s613_s13 = smov 0   ;;  %s710_s0 = inlined_call_operand.vmem [shape: f32[2,4,256], index: 0, kind: input, shape index: {}]   ;;  %s711_s1 = inlined_call_operand.vmem [shape: f32[10,4], index: 1, kind: input, shape index: {}]   ;;  %s712_s2 = inlined_call_operand.vmem [shape: f32[4,10], index: 2, kind: input, shape index: {}]   ;;  %s713_s3 = inlined_call_operand.vmem [shape: f32[2,4,256], index: 3, kind: output, shape index: {}]  }
   0x1   :  { %s615_s14 = smov 0  }
   0x2 LB: > { %s25_s15 = sadd.s32 1, %s585_s13  ;;  %p504_p0 = scmp.ge.s32.totalorder %s589_s14, 1  ;;  %s589_s14 = sphi %s615_s14, %s13_s14   ;;  %s585_s13 = sphi %s613_s13, %s719_s13   ;;  %s581_s12 = sphi %s611_s12, %s718_s12  }
   0x3   : > { %p27_p1 = scmp.ge.s32.totalorder %s25_s15, 2  ;;  %p158_p2 = scmp.lt.s32.totalorder %s589_s14, 3 }
   0x5   : > { %s721_s15 = smov (%p27_p1, %s25_s15), 0  ;;  %p159_p3 = pnand %p504_p0, %p158_p2 }
   0x6   : > { %p191_p4 = scmp.lt.s32.totalorder (!%p159_p3), %s581_s12, 1 }
   0x7   : > { %162 = sbr.rel (%p159_p3) target bundleno = 331 (0x14b), region = 32 }
   0xc   : > { %s723_s12 = smov (!%p191_p4, %s581_s12), 1  ;;  %vm224_vm0 = vcmask 1043456   ;;  %v210_v1 = vld [vmem:[%s711_s1] sm:$0xff]  ;;  %vm217_vm1 = vcmask 31744   ;;  %v211_v4 = vld [vmem:[%s711_s1 + $0x8] sm:$0x3] }
   0xd   : > { %s525_s16 = sshll.u32 %s723_s12, 3  ;;  %vm360_vm2 = vcmask 1041408  }
   0xe   : > { %s198_s19 = scalar_lea.vmem %s710_s0, %s525_s16  ;;  %s208_s28 = scalar_lea.vmem %s713_s3, %s525_s16 }
   0xf   : > { %v212_v0 = vld [vmem:[%s198_s19] sm:$0xff] }
  0x10   : > { %214 = vst [vmem:[#allocation1] ss:$2 sm:$0xff] %v212_v0 }
  0x17   : > { %v215_v2 = vld.sshfl [vmem:[#allocation1] sm:$0xff pattern:$0x75316420]  ;;  %v216_v3 = vld.sshfl [vmem:[#allocation1 + $0x8] sm:$0xff pattern:$0x75316420] }
  0x18   : > { %509 = vmatpush.msk.msra.mxu0 %vm224_vm0, %v215_v2  ;;  %512 = vmatpush.msk.msra.mxu1 %vm224_vm0, %v216_v3  ;;  %v355_v2 = vld [vmem:[%s712_s2] sm:$0xf] }
  0x19   : > { %510 = vmatmul.msk.f32.vlgmr.msra.gmra.mxu0 %vm217_vm1, %v210_v1  ;;  %513 = vmatmul.msk.f32.vlgmr.msra.gmra.mxu1 %vm217_vm1, %v210_v1 }
  0x21   : > { %511 = vmatmul.msk.f32.gmra.mxu0 %vm217_vm1, %v211_v4  ;;  %514 = vmatmul.msk.f32.gmra.mxu1 %vm217_vm1, %v211_v4 }
  0x96   : > { %v645_v5 = vpop.f32.mrf.mxu0  ;;  %v647_v6 = vpop.f32.mrf.mxu1 }
  0x97   : > { %v515_v7 = vmul.f32 -1.442695, %v645_v5  ;;  %v516_v8 = vmul.f32 -1.442695, %v647_v6 }
  0x99   : > { %551 = vpow2.f32 %v515_v7 }
  0x9a   : > { %553 = vpow2.f32 %v516_v8 }
  0x9e   : > { %v651_v9 = vpop.f32.mrf.mxu0  ;;  %v653_v10 = vpop.f32.mrf.mxu1 }
  0x9f   : > { %v552_v11 = vpop.eup %551  ;;  %v517_v12 = vmul.f32 -1.442695, %v651_v9  ;;  %v518_v15 = vmul.f32 -1.442695, %v653_v10 }
  0xa0   : > { %v554_v13 = vpop.eup %553  ;;  %v287_v14 = vadd.f32 1.0, %v552_v11 }
  0xa1   : > { %v657_v16 = vadd.f32 1.0, %v554_v13  ;;  %555 = vpow2.f32 %v517_v12 }
  0xa2   : > { %557 = vrcp.f32 %v287_v14  ;;  %vm296_vm3 = vweird.f32 %v287_v14  ;;  %v302_v30 = vand.u32 2147483648, %v287_v14  ;;  %v300_v35 = vand.u32 2147483647, %v287_v14 }
  0xa3   : > { %559 = vrcp.f32 %v657_v16  ;;  %vm311_vm5 = vweird.f32 %v657_v16  ;;  %v315_v38 = vand.u32 2147483647, %v657_v16  ;;  %v317_v41 = vand.u32 2147483648, %v657_v16 }
  0xa4   : > { %561 = vpow2.f32 %v518_v15  ;;  %v303_v44 = vor.u32 1.1754944e-38, %v302_v30  ;;  %vm301_vm14 = vcmp.eq.f32.partialorder %v300_v35, 8.507059e+37 }
  0xa5   : > { %v318_v60 = vor.u32 1.1754944e-38, %v317_v41 }
  0xa7   : > { %v556_v17 = vpop.eup %555 }
  0xa8   : > { %v558_v18 = vpop.eup %557  ;;  %v289_v19 = vadd.f32 1.0, %v556_v17 }
  0xa9   : > { %v660_v20 = vpop.eup %559  ;;  %v292_v21 = vmul.f32 %v558_v18, %v287_v14  ;;  %vm297_vm4 = vweird.f32 %v558_v18 }
  0xaa   : > { %v562_v22 = vpop.eup %561  ;;  %563 = vrcp.f32 %v289_v19  ;;  %v307_v25 = vmul.f32 %v660_v20, %v657_v16  ;;  %v332_v36 = vand.u32 2147483648, %v289_v19  ;;  %v330_v40 = vand.u32 2147483647, %v289_v19  ;;  %vm669_vm7 = vmor %vm296_vm3, %vm297_vm4 }
  0xab   : > { %v290_v23 = vadd.f32 1.0, %v562_v22  ;;  %v293_v24 = vsub.f32 1.0, %v292_v21  ;;  %vm312_vm8 = vweird.f32 %v660_v20  ;;  %vm326_vm9 = vweird.f32 %v289_v19 }
  0xac   : > { %v308_v26 = vsub.f32 1.0, %v307_v25  ;;  %v333_v49 = vor.u32 1.1754944e-38, %v332_v36  ;;  %vm331_vm12 = vcmp.eq.f32.partialorder %v330_v40, 8.507059e+37  ;;  %vm679_vm15 = vmor %vm311_vm5, %vm312_vm8  ;;  %vm316_vm4 = vcmp.eq.f32.partialorder %v315_v38, 8.507059e+37 }
  0xad   : > { %565 = vrcp.f32 %v290_v23  ;;  %v294_v27 = vmul.f32 %v558_v18, %v293_v24  ;;  %v347_v47 = vand.u32 2147483648, %v290_v23  ;;  %v345_v51 = vand.u32 2147483647, %v290_v23 }
  0xae   : > { %v309_v31 = vmul.f32 %v660_v20, %v308_v26  ;;  %vm341_vm13 = vweird.f32 %v290_v23  ;;  %vm356_vm5 = vcmask 80896  }
  0xaf   : > { %v295_v34 = vadd.f32 %v558_v18, %v294_v27  ;;  %v348_v59 = vor.u32 1.1754944e-38, %v347_v47  ;;  %vm346_vm3 = vcmp.eq.f32.partialorder %v345_v51, 8.507059e+37 }
  0xb0   : > { %v564_v28 = vpop.eup %563  ;;  %v310_v45 = vadd.f32 %v660_v20, %v309_v31 }
  0xb1   : > { %v322_v29 = vmul.f32 %v564_v28, %v289_v19  ;;  %vm327_vm6 = vweird.f32 %v564_v28  ;;  %v299_v48 = vsel %vm669_vm7, %v558_v18, %v295_v34 }
  0xb2   : > { %vm328_vm10 = vmor %vm326_vm9, %vm327_vm6  ;;  %v304_v56 = vsel %vm301_vm14, %v303_v44, %v299_v48  ;;  %v314_v57 = vsel %vm679_vm15, %v660_v20, %v310_v45 }
  0xb3   : > { %v566_v32 = vpop.eup %565  ;;  %v323_v33 = vsub.f32 1.0, %v322_v29  ;;  %v351_v63 = vmul.f32 %v304_v56, %v645_v5  ;;  %v319_v0 = vsel %vm316_vm4, %v318_v60, %v314_v57 }
  0xb4   : > { %v337_v37 = vmul.f32 %v566_v32, %v290_v23  ;;  %vm342_vm11 = vweird.f32 %v566_v32  ;;  %v352_v3 = vmul.f32 %v319_v0, %v647_v6 }
  0xb5   : > { %v324_v39 = vmul.f32 %v564_v28, %v323_v33  ;;  %vm343_vm1 = vmor %vm341_vm13, %vm342_vm11 }
  0xb6   : > { %v338_v42 = vsub.f32 1.0, %v337_v37 }
  0xb7   : > { %v325_v46 = vadd.f32 %v564_v28, %v324_v39 }
  0xb8   : > { %v339_v50 = vmul.f32 %v566_v32, %v338_v42 }
  0xb9   : > { %v329_v52 = vsel %vm328_vm10, %v564_v28, %v325_v46 }
  0xba   : > { %v334_v54 = vsel %vm331_vm12, %v333_v49, %v329_v52  ;;  %v340_v55 = vadd.f32 %v566_v32, %v339_v50 }
  0xbb   : > { %v353_v58 = vmul.f32 %v334_v54, %v651_v9 }
  0xbc   : > { %v344_v61 = vsel %vm343_vm1, %v566_v32, %v340_v55 }
  0xbd   : > { %v349_v62 = vsel %vm346_vm3, %v348_v59, %v344_v61  ;;  %519 = vmatpush.msk.msra.mxu2 %vm360_vm2, %v353_v58 }
  0xbe   : > { %v354_v1 = vmul.f32 %v349_v62, %v653_v10 }
  0xbf   : > { %382 = vmatpush.msra.mxu2 %v351_v63 }
  0xc0   : > { %521 = vmatpush.msk.msra.mxu3 %vm360_vm2, %v354_v1  ;;  %520 = vmatmul.msk.f32.vlgmr.msra.gmra.mxu2 %vm356_vm5, %v355_v2 }
  0xc2   : > { %402 = vmatpush.msra.mxu3 %v352_v3 }
  0xc3   : > { %522 = vmatmul.msk.f32.vlgmr.msra.gmra.mxu3 %vm356_vm5, %v355_v2 }
 0x143   : > { %v384_v7 = vpop.f32.mrf.mxu2 }
 0x146   : > { %v404_v4 = vpop.f32.mrf.mxu3 }
 0x147   : > { %v409_v8 = vrot.slane %v404_v4, 4 }
 0x149   : > { %v410_v5 = vsel %vm224_vm0, %v384_v7, %v409_v8 }
 0x14a   : > { %412 = vst [vmem:[%s208_s28] sm:$0xff] %v410_v5 }
 0x14b PF: > { %s13_s14 = sadd.s32 1, %s589_s14   ;;  %s718_s12 = smov %s585_s13 }
 0x14c   : > { %p10_p5 = scmp.ge.s32.totalorder %s13_s14, 4   ;;  %s719_s13 = smov %s721_s15 }
 0x14e   :  { %12 = sbr.rel (!%p10_p5) target bundleno = 2 (0x2), region = 62 }

</bundles_post_ra>
